<compile_context>
chip_gen: v6e
topology: v6e:2x2x1
jax: 0.10.0
libtpu: 0.0.40
codegen_flags: <defaults>
</compile_context>

<pallas_src>
import functools

import jax
import jax.numpy as jnp
import numpy as np
from jax.experimental import pallas as pl
from jax.experimental.pallas import tpu as pltpu


def _round8(v):
    return ((v + 7) // 8) * 8


# ----------------------------------------------------------------------------
# Fused Pallas kernel: BN -> GCN1 -> leaky_relu -> GCN2 (+gather) -> NTN decode
# ----------------------------------------------------------------------------
def ntn_fused_kernel(x_ref, adj_ref, enc_ref, dec_ref,           # VMEM inputs (4)
                     out_ref,                                    # VMEM (E_pad, 128)
                     *, n, cin, hid, d, k, e_pad,
                     o_b1, o_w2, o_b2, o_pdst, o_sumsel, o_bu):
    kd = k * d
    wd = kd + k

    # -------- BatchNorm1d with batch statistics (weight=1, bias=0 at init) ----------
    x = x_ref[...]                                               # (N, Cin) f32
    mean = jnp.mean(x, axis=0, keepdims=True)
    var = jnp.mean((x - mean) ** 2, axis=0, keepdims=True)
    xn = (x - mean) * jax.lax.rsqrt(var + 1e-5)
    # NOTE: at larger N, fold mean/rsqrt into W1 (or do the reductions as a ones-row
    # matmul) to keep the XLU out of the critical path; at N=16 this is one vreg.

    # -------- encoder weights: static slices of the packed buffer (free) ------------
    w1 = enc_ref[0:cin, 0:hid]                                   # (Cin, HID)
    b1 = enc_ref[o_b1:o_b1 + 1, 0:hid]                           # (1, HID)
    w2 = enc_ref[o_w2:o_w2 + hid, 0:d]                           # (HID, D)
    b2 = enc_ref[o_b2:o_b2 + 1, 0:d]                             # (1, D)

    a = adj_ref[0:n, :]                                          # A_hat        (N, N)
    sa = adj_ref[n:n + 2 * e_pad, :]                             # [Ssrc;Sdst]@A_hat

    # -------- GCN layer 1 + leaky_relu(0.1) ------------------------------------------
    h = jnp.dot(xn, w1, preferred_element_type=jnp.float32)
    h = jnp.dot(a, h, preferred_element_type=jnp.float32) + b1
    h = jnp.where(h > 0, h, 0.1 * h)

    # -------- GCN layer 2 fused with the edge gather ----------------------------------
    #   [src; dst] = S @ z = (S @ A_hat) @ (h @ W2) + b2
    # z is never materialized; no VMEM scratch, no dynamic-index loads.
    hw2 = jnp.dot(h, w2, preferred_element_type=jnp.float32)     # (N, D)
    sd = jnp.dot(sa, hw2, preferred_element_type=jnp.float32) + b2   # (2*E_pad, D)
    src = sd[0:e_pad, :]                                         # (E_pad, D)
    dst = sd[e_pad:2 * e_pad, :]                                 # (E_pad, D)

    # -------- NTN decoder --------------------------------------------------------------
    p_src = dec_ref[0:d, :]                                      # [W_flat | V_src] (D, Wd)
    p_dst = dec_ref[o_pdst:o_pdst + d, :]                        # [rep_I  | V_dst] (D, Wd)
    sumsel = dec_ref[o_sumsel:o_sumsel + wd, 0:k]                # block-sum selector (Wd, k)
    b_ntn = dec_ref[o_bu:o_bu + 1, 0:k]                          # (1, k)
    u_row = dec_ref[o_bu + 1:o_bu + 2, 0:k]                      # (1, k)

    src_big = jnp.dot(src, p_src, preferred_element_type=jnp.float32)  # (E_pad, Wd)
    dst_big = jnp.dot(dst, p_dst, preferred_element_type=jnp.float32)  # (E_pad, Wd)

    #   src_big[:, :kD] = tmp[e, i*D+b] = sum_a src[e,a] W[a,b,i]
    #   dst_big[:, :kD] = dst replicated k times (via rep_I), last k cols = V halves.
    prod = src_big * dst_big
    bil = jnp.dot(prod, sumsel, preferred_element_type=jnp.float32)    # (E_pad, k)
    lin = (src_big + dst_big)[:, kd:kd + k]                            # (E_pad, k)

    xk = jnp.tanh(bil + lin + b_ntn)
    # TODO(synk): Dropout(p=0.2) treated as eval-mode identity (no RNG mask here).

    # Final score: VPU multiply + lane reduce (no 1-wide MXU matmul); lane-dense store.
    score = jnp.sum(xk * u_row, axis=-1, keepdims=True)                # (E_pad, 1)
    out_ref[...] = jnp.broadcast_to(jax.nn.sigmoid(score), out_ref.shape)


# ----------------------------------------------------------------------------
# Host-side packing helpers & wrapper
# ----------------------------------------------------------------------------
_VMEM = pl.BlockSpec(memory_space=pltpu.MemorySpace.VMEM)


def _pack_rows(blocks):
    """Stack 2-D blocks vertically at 8-aligned row offsets. Returns (pack, offsets)."""
    width = max(b.shape[1] for b in blocks)
    offs, chunks, row = [], [], 0
    for b in blocks:
        offs.append(row)
        r = _round8(max(b.shape[0], 1))
        chunks.append(jnp.pad(b, ((0, r - b.shape[0]), (0, width - b.shape[1]))))
        row += r
    return jnp.concatenate(chunks, axis=0), offs


def gcn_normalized_adjacency(edge_index, num_nodes):
    """Dense A_hat = D^{-1/2} (A + I) D^{-1/2} as used by torch_geometric GCNConv."""
    src, dst = edge_index[0], edge_index[1]
    loop = jnp.arange(num_nodes, dtype=edge_index.dtype)
    src_sl = jnp.concatenate([src, loop])
    dst_sl = jnp.concatenate([dst, loop])
    deg = jnp.zeros((num_nodes,), jnp.float32).at[dst_sl].add(1.0)
    dis = jnp.where(deg > 0, jax.lax.rsqrt(jnp.maximum(deg, 1e-12)), 0.0)
    norm = dis[src_sl] * dis[dst_sl]
    a = jnp.zeros((num_nodes, num_nodes), jnp.float32).at[dst_sl, src_sl].add(norm)
    return a


@jax.jit
def ntn_conv_forward(params, x, edge_index):
    n, cin = x.shape
    e = edge_index.shape[1]
    hid = params["W1"].shape[1]
    d = params["W2"].shape[1]
    k = params["W_ntn"].shape[0]
    e_pad = _round8(e)
    kd, wd = k * d, k * d + k

    a_hat = gcn_normalized_adjacency(edge_index, n)

    # Edge gather folded host-side into a selection matrix (padded to a sublane
    # multiple with zero rows): SA = [one_hot(src); one_hot(dst)] @ A_hat.
    s_src = jax.nn.one_hot(edge_index[0], n, dtype=jnp.float32)
    s_dst = jax.nn.one_hot(edge_index[1], n, dtype=jnp.float32)
    pad = ((0, e_pad - e), (0, 0))
    sel = jnp.concatenate([jnp.pad(s_src, pad), jnp.pad(s_dst, pad)], axis=0)
    sa = sel @ a_hat                                             # (2*E_pad, N)
    adj_pack = jnp.concatenate([a_hat, sa], axis=0)              # (N + 2*E_pad, N)

    # Packed encoder weights: W1, b1, W2, b2.
    enc_pack, (_, o_b1, o_w2, o_b2) = _pack_rows(
        [params["W1"], params["b1"], params["W2"], params["b2"]])

    # Packed decoder weights:
    #   W_flat[a, i*D+b] = W[a, b, i] ; rep_I[b, i*D+b'] = (b == b')
    #   P_src = [W_flat | V_src] ; P_dst = [rep_I | V_dst]
    #   sumsel[r, i] = 1 for r in [i*D, (i+1)*D), zero on the trailing k rows.
    w_flat = jnp.transpose(params["W_ntn"], (1, 0, 2)).reshape(d, kd)     # (D, k*D)
    rep_i = jnp.tile(jnp.eye(d, dtype=jnp.float32), (1, k))               # (D, k*D)
    p_src = jnp.concatenate([w_flat, params["Vt"][:d]], axis=1)           # (D, Wd)
    p_dst = jnp.concatenate([rep_i, params["Vt"][d:]], axis=1)            # (D, Wd)
    sumsel = jnp.concatenate(
        [jnp.repeat(jnp.eye(k, dtype=jnp.float32), d, axis=0),
         jnp.zeros((k, k), jnp.float32)], axis=0)                         # (Wd, k)
    bu = jnp.concatenate([params["b_ntn"], params["Ut"].reshape(1, k)], axis=0)  # (2, k)
    dec_pack, (_, o_pdst, o_sumsel, o_bu) = _pack_rows([p_src, p_dst, sumsel, bu])

    flops = 2 * (n * cin * hid + n * n * hid + n * hid * d            # encode
                 + 2 * e_pad * n * d                                  # fused gather+GCN2
                 + 2 * e_pad * d * wd + e_pad * wd * k)               # decode
    transcendentals = n * cin + e_pad * (k + 1)
    bytes_accessed = 4 * (x.size + adj_pack.size + enc_pack.size
                          + dec_pack.size + e_pad * 128)

    kernel = functools.partial(
        ntn_fused_kernel, n=n, cin=cin, hid=hid, d=d, k=k, e_pad=e_pad,
        o_b1=o_b1, o_w2=o_w2, o_b2=o_b2,
        o_pdst=o_pdst, o_sumsel=o_sumsel, o_bu=o_bu)

    # TODO(synk): at non-toy N/E, tile with a grid over node-row / edge blocks and
    # dimension_semantics=("parallel", ...) (v7x: 2 TCs, 64 MiB VMEM) and cast matmul
    # inputs to bf16; the grid-less single-block f32 design is intentional at N=16/E=12.
    out_padded = pl.pallas_call(
        kernel,
        out_shape=jax.ShapeDtypeStruct((e_pad, 128), jnp.float32),
        in_specs=[_VMEM] * 4,
        out_specs=_VMEM,
        cost_estimate=pl.CostEstimate(flops=flops,
                                      transcendentals=transcendentals,
                                      bytes_accessed=bytes_accessed),
    )(x, adj_pack, enc_pack, dec_pack)

    return out_padded[:e, 0]


# ----------------------------------------------------------------------------
# Pure-JAX reference (sanity check of the Pallas path)
# ----------------------------------------------------------------------------
def ntn_conv_forward_ref(params, x, edge_index):
    n = x.shape[0]
    a = gcn_normalized_adjacency(edge_index, n)
    mean = jnp.mean(x, axis=0, keepdims=True)
    var = jnp.mean((x - mean) ** 2, axis=0, keepdims=True)
    xn = (x - mean) / jnp.sqrt(var + 1e-5)
    h = a @ (xn @ params["W1"]) + params["b1"]
    h = jnp.where(h > 0, h, 0.1 * h)
    z = a @ (h @ params["W2"]) + params["b2"]
    src, dst = z[edge_index[0]], z[edge_index[1]]
    bil = jnp.einsum("ea,kab,eb->ek", src, params["W_ntn"], dst)
    lin = jnp.concatenate([src, dst], axis=-1) @ params["Vt"]
    xx = jnp.tanh(bil + lin + params["b_ntn"])
    return jax.nn.sigmoid(xx @ params["Ut"]).reshape(-1)


# ----------------------------------------------------------------------------
# Deterministic parameter init (synthetic; shapes follow the module __init__)
# ----------------------------------------------------------------------------
def init_params(key, in_channels, hidden_channels, out_channels, k):
    d = out_channels
    ks = jax.random.split(key, 6)

    def glorot(rng, shape, fan_in, fan_out):
        lim = jnp.sqrt(6.0 / (fan_in + fan_out))
        return jax.random.uniform(rng, shape, jnp.float32, -lim, lim)

    params = {
        # GCNConv 1 / 2 (weight glorot, bias zeros — torch_geometric defaults)
        "W1": glorot(ks[0], (in_channels, hidden_channels), in_channels, hidden_channels),
        "b1": jnp.zeros((1, hidden_channels), jnp.float32),
        "W2": glorot(ks[1], (hidden_channels, d), hidden_channels, d),
        "b2": jnp.zeros((1, d), jnp.float32),
        # NTN tensor W (d, d, k) stored as (k, d, d) with W_ntn[i] = W[:, :, i]
        "W_ntn": glorot(ks[2], (k, d, d), d * k, d * k),
        # V (k, 2d) stored transposed as (2d, k)
        "Vt": glorot(ks[3], (2 * d, k), 2 * d, k),
        # b (k, 1) stored as (1, k); U (1, k) stored as (k, 1)
        "b_ntn": 0.01 * jax.random.normal(ks[4], (1, k), jnp.float32),
        "Ut": 0.01 * jax.random.normal(ks[5], (k, 1), jnp.float32),
    }
    return params


# ----------------------------------------------------------------------------
if __name__ == "__main__":
    key = jax.random.PRNGKey(0)
    k_x, k_e, k_p = jax.random.split(key, 3)

    N = 16            # nodes
    IN_C = 8          # in_channels
    HID_C = 16        # hidden_channels
    OUT_C = 8         # out_channels (= d)
    K = 4             # NTN slices
    E = 12            # edges

    x = jax.random.normal(k_x, (N, IN_C), jnp.float32)
    edge_index = jax.random.randint(k_e, (2, E), 0, N, jnp.int32)

    params = init_params(k_p, IN_C, HID_C, OUT_C, K)

    out = ntn_conv_forward(params, x, edge_index)
    out = jax.block_until_ready(out)

    ref = jax.block_until_ready(ntn_conv_forward_ref(params, x, edge_index))
    np.testing.assert_allclose(np.asarray(out), np.asarray(ref), rtol=1e-5, atol=1e-5)

    assert out.shape == (E,)
    print("KERNEL_OK")
</pallas_src>

<mosaic_0001>
module attributes {stable_mosaic.version = 11 : i64} {
  func.func @ntn_fused_kernel(%arg0: memref<16x8xf32, #tpu.memory_space<vmem>>, %arg1: memref<48x16xf32, #tpu.memory_space<vmem>>, %arg2: memref<40x16xf32, #tpu.memory_space<vmem>>, %arg3: memref<64x36xf32, #tpu.memory_space<vmem>>, %arg4: memref<16x128xf32, #tpu.memory_space<vmem>>) attributes {dimension_semantics = [], scalar_prefetch = 0 : i64, scratch_operands = 0 : i64, tpu.core_type = #tpu.core_type<tc>} {
    %c0 = arith.constant 0 : index
    %c0_0 = arith.constant 0 : index
    %0 = vector.load %arg0[%c0, %c0_0] : memref<16x8xf32, #tpu.memory_space<vmem>>, vector<16x8xf32>
    %cst = arith.constant dense<0.000000e+00> : vector<8xf32>
    %1 = vector.multi_reduction <add>, %0, %cst [0] : vector<16x8xf32> to vector<8xf32>
    %2 = vector.shape_cast %1 : vector<8xf32> to vector<1x8xf32>
    %cst_1 = arith.constant 1.600000e+01 : f32
    %3 = vector.broadcast %cst_1 : f32 to vector<1x8xf32>
    %4 = arith.divf %2, %3 : vector<1x8xf32>
    %5 = vector.broadcast %4 : vector<1x8xf32> to vector<16x8xf32>
    %6 = arith.subf %0, %5 : vector<16x8xf32>
    %7 = arith.mulf %6, %6 : vector<16x8xf32>
    %cst_2 = arith.constant dense<0.000000e+00> : vector<8xf32>
    %8 = vector.multi_reduction <add>, %7, %cst_2 [0] : vector<16x8xf32> to vector<8xf32>
    %9 = vector.shape_cast %8 : vector<8xf32> to vector<1x8xf32>
    %cst_3 = arith.constant 1.600000e+01 : f32
    %10 = vector.broadcast %cst_3 : f32 to vector<1x8xf32>
    %11 = arith.divf %9, %10 : vector<1x8xf32>
    %12 = vector.broadcast %4 : vector<1x8xf32> to vector<16x8xf32>
    %13 = arith.subf %0, %12 : vector<16x8xf32>
    %cst_4 = arith.constant 9.99999974E-6 : f32
    %14 = vector.broadcast %cst_4 : f32 to vector<1x8xf32>
    %15 = arith.addf %11, %14 : vector<1x8xf32>
    %16 = math.rsqrt %15 : vector<1x8xf32>
    %17 = vector.broadcast %16 : vector<1x8xf32> to vector<16x8xf32>
    %18 = arith.mulf %13, %17 : vector<16x8xf32>
    %c0_5 = arith.constant 0 : index
    %c0_6 = arith.constant 0 : index
    %19 = vector.load %arg2[%c0_5, %c0_6] : memref<40x16xf32, #tpu.memory_space<vmem>>, vector<8x16xf32>
    %c8 = arith.constant 8 : index
    %c0_7 = arith.constant 0 : index
    %20 = vector.load %arg2[%c8, %c0_7] : memref<40x16xf32, #tpu.memory_space<vmem>>, vector<1x16xf32>
    %c16 = arith.constant 16 : index
    %c0_8 = arith.constant 0 : index
    %21 = vector.load %arg2[%c16, %c0_8] : memref<40x16xf32, #tpu.memory_space<vmem>>, vector<16x8xf32>
    %c32 = arith.constant 32 : index
    %c0_9 = arith.constant 0 : index
    %22 = vector.load %arg2[%c32, %c0_9] : memref<40x16xf32, #tpu.memory_space<vmem>>, vector<1x8xf32>
    %c0_10 = arith.constant 0 : index
    %c0_11 = arith.constant 0 : index
    %23 = vector.load %arg1[%c0_10, %c0_11] : memref<48x16xf32, #tpu.memory_space<vmem>>, vector<16x16xf32>
    %c16_12 = arith.constant 16 : index
    %c0_13 = arith.constant 0 : index
    %24 = vector.load %arg1[%c16_12, %c0_13] : memref<48x16xf32, #tpu.memory_space<vmem>>, vector<32x16xf32>
    %cst_14 = arith.constant dense<0.000000e+00> : vector<16x16xf32>
    %25 = tpu.matmul %18, %19, %cst_14 {dimension_numbers = #tpu.dot_dimension_numbers<[1], [0], [0], [1], [0, 0, 1, 1], [], []>} : vector<16x8xf32>, vector<8x16xf32>, vector<16x16xf32> -> vector<16x16xf32>
    %cst_15 = arith.constant dense<0.000000e+00> : vector<16x16xf32>
    %26 = tpu.matmul %23, %25, %cst_15 {dimension_numbers = #tpu.dot_dimension_numbers<[1], [0], [0], [1], [0, 0, 1, 1], [], []>} : vector<16x16xf32>, vector<16x16xf32>, vector<16x16xf32> -> vector<16x16xf32>
    %27 = vector.broadcast %20 : vector<1x16xf32> to vector<16x16xf32>
    %28 = arith.addf %26, %27 : vector<16x16xf32>
    %cst_16 = arith.constant 0.000000e+00 : f32
    %29 = vector.broadcast %cst_16 : f32 to vector<16x16xf32>
    %30 = arith.cmpf ogt, %28, %29 : vector<16x16xf32>
    %cst_17 = arith.constant 1.000000e-01 : f32
    %31 = vector.broadcast %cst_17 : f32 to vector<16x16xf32>
    %32 = arith.mulf %31, %28 : vector<16x16xf32>
    %33 = arith.select %30, %28, %32 : vector<16x16xi1>, vector<16x16xf32>
    %cst_18 = arith.constant dense<0.000000e+00> : vector<16x8xf32>
    %34 = tpu.matmul %33, %21, %cst_18 {dimension_numbers = #tpu.dot_dimension_numbers<[1], [0], [0], [1], [0, 0, 1, 1], [], []>} : vector<16x16xf32>, vector<16x8xf32>, vector<16x8xf32> -> vector<16x8xf32>
    %cst_19 = arith.constant dense<0.000000e+00> : vector<32x8xf32>
    %35 = tpu.matmul %24, %34, %cst_19 {dimension_numbers = #tpu.dot_dimension_numbers<[1], [0], [0], [1], [0, 0, 1, 1], [], []>} : vector<32x16xf32>, vector<16x8xf32>, vector<32x8xf32> -> vector<32x8xf32>
    %36 = vector.broadcast %22 : vector<1x8xf32> to vector<32x8xf32>
    %37 = arith.addf %35, %36 : vector<32x8xf32>
    %38 = vector.extract_strided_slice %37 {offsets = [0, 0], sizes = [16, 8], strides = [1, 1]} : vector<32x8xf32> to vector<16x8xf32>
    %39 = vector.extract_strided_slice %37 {offsets = [16, 0], sizes = [16, 8], strides = [1, 1]} : vector<32x8xf32> to vector<16x8xf32>
    %c0_20 = arith.constant 0 : index
    %c0_21 = arith.constant 0 : index
    %40 = vector.load %arg3[%c0_20, %c0_21] : memref<64x36xf32, #tpu.memory_space<vmem>>, vector<8x36xf32>
    %c8_22 = arith.constant 8 : index
    %c0_23 = arith.constant 0 : index
    %41 = vector.load %arg3[%c8_22, %c0_23] : memref<64x36xf32, #tpu.memory_space<vmem>>, vector<8x36xf32>
    %c16_24 = arith.constant 16 : index
    %c0_25 = arith.constant 0 : index
    %42 = vector.load %arg3[%c16_24, %c0_25] : memref<64x36xf32, #tpu.memory_space<vmem>>, vector<36x4xf32>
    %c56 = arith.constant 56 : index
    %c0_26 = arith.constant 0 : index
    %43 = vector.load %arg3[%c56, %c0_26] : memref<64x36xf32, #tpu.memory_space<vmem>>, vector<1x4xf32>
    %c57 = arith.constant 57 : index
    %c0_27 = arith.constant 0 : index
    %44 = vector.load %arg3[%c57, %c0_27] : memref<64x36xf32, #tpu.memory_space<vmem>>, vector<1x4xf32>
    %cst_28 = arith.constant dense<0.000000e+00> : vector<16x36xf32>
    %45 = tpu.matmul %38, %40, %cst_28 {dimension_numbers = #tpu.dot_dimension_numbers<[1], [0], [0], [1], [0, 0, 1, 1], [], []>} : vector<16x8xf32>, vector<8x36xf32>, vector<16x36xf32> -> vector<16x36xf32>
    %cst_29 = arith.constant dense<0.000000e+00> : vector<16x36xf32>
    %46 = tpu.matmul %39, %41, %cst_29 {dimension_numbers = #tpu.dot_dimension_numbers<[1], [0], [0], [1], [0, 0, 1, 1], [], []>} : vector<16x8xf32>, vector<8x36xf32>, vector<16x36xf32> -> vector<16x36xf32>
    %47 = arith.mulf %45, %46 : vector<16x36xf32>
    %cst_30 = arith.constant dense<0.000000e+00> : vector<16x4xf32>
    %48 = tpu.matmul %47, %42, %cst_30 {dimension_numbers = #tpu.dot_dimension_numbers<[1], [0], [0], [1], [0, 0, 1, 1], [], []>} : vector<16x36xf32>, vector<36x4xf32>, vector<16x4xf32> -> vector<16x4xf32>
    %49 = arith.addf %45, %46 : vector<16x36xf32>
    %50 = vector.extract_strided_slice %49 {offsets = [0, 32], sizes = [16, 4], strides = [1, 1]} : vector<16x36xf32> to vector<16x4xf32>
    %51 = arith.addf %48, %50 : vector<16x4xf32>
    %52 = vector.broadcast %43 : vector<1x4xf32> to vector<16x4xf32>
    %53 = arith.addf %51, %52 : vector<16x4xf32>
    %54 = math.tanh %53 : vector<16x4xf32>
    %55 = vector.broadcast %44 : vector<1x4xf32> to vector<16x4xf32>
    %56 = arith.mulf %54, %55 : vector<16x4xf32>
    %cst_31 = arith.constant dense<0.000000e+00> : vector<16xf32>
    %57 = vector.multi_reduction <add>, %56, %cst_31 [1] : vector<16x4xf32> to vector<16xf32>
    %58 = vector.shape_cast %57 : vector<16xf32> to vector<16x1xf32>
    %59 = arith.negf %58 : vector<16x1xf32>
    %60 = math.exp %59 : vector<16x1xf32>
    %cst_32 = arith.constant 1.000000e+00 : f32
    %61 = vector.broadcast %cst_32 : f32 to vector<16x1xf32>
    %62 = arith.addf %61, %60 : vector<16x1xf32>
    %63 = arith.divf %61, %62 : vector<16x1xf32>
    %64 = vector.shape_cast %63 : vector<16x1xf32> to vector<16x1xf32>
    %65 = vector.broadcast %64 : vector<16x1xf32> to vector<16x128xf32>
    %c0_33 = arith.constant 0 : index
    %c0_34 = arith.constant 0 : index
    %66 = vector.load %arg4[%c0_33, %c0_34] : memref<16x128xf32, #tpu.memory_space<vmem>>, vector<16x128xf32>
    tpu.vector_store %arg4[%c0_33, %c0_34], %65 {strides = array<i32>} : memref<16x128xf32, #tpu.memory_space<vmem>>, vector<16x128xf32>,
    return
  }
}

</mosaic_0001>

<bundles_post_ra>
// kernel: mul.1
= control target key start
LH: loop header
LB: loop body
LE: loop exit
PB: predicated region body
PF: predicated region fallthrough
CT: control target
= control target key end

     0   :  { %s34_s0 = inlined_call_operand.vmem [shape: f32[28], index: 0, kind: input, shape index: {}]   ;;  %s35_s1 = inlined_call_operand.vmem [shape: f32[28], index: 1, kind: input, shape index: {}]   ;;  %s36_s2 = inlined_call_operand.vmem [shape: f32[28], index: 2, kind: output, shape index: {}]  }
   0x1   :  { %v3_v0 = vld [vmem:[%s34_s0] sm:$0x1] }
   0x2   :  { %v4_v1 = vld [vmem:[%s35_s1] sm:$0x1] }
   0x3   :  { %v7_v2 = vmul.f32 %v4_v1, %v3_v0 }
   0x5   :  { %9 = vst [vmem:[%s36_s2] sm:$0x1] %v7_v2 }

// kernel: tile.9
= control target key start
LH: loop header
LB: loop body
LE: loop exit
PB: predicated region body
PF: predicated region fallthrough
CT: control target
= control target key end

     0   :  { %vm43_vm0 = vcmask 1047556   ;;  %vm45_vm1 = vcmask 64512   ;;  %s94_s22 = smov 8   ;;  %s95_s25 = smov 16   ;;  %vm55_vm2 = vcmask 261312   ;;  %vm65_vm3 = vcmask 195712   ;;  %s147_s0 = inlined_call_operand.vmem [shape: f32[8,4,8], index: 0, kind: input, shape index: {}]   ;;  %s148_s1 = inlined_call_operand.vmem [shape: f32[8,32], index: 1, kind: output, shape index: {}]  }
   0x1   :  { %v83_v0 = vld [vmem:[%s147_s0 + $0x1c] sm:$0xf]  ;;  %v84_v1 = vld [vmem:[%s147_s0 + $0x18] sm:$0xf]  ;;  %v85_v2 = vld [vmem:[%s147_s0 + $0x14] sm:$0xf] }
   0x2   :  { %9 = vst [vmem:[#allocation0 + $0x38] sm:$0xf] %v83_v0  ;;  %14 = vst [vmem:[#allocation0 + $0x30] sm:$0xf] %v84_v1  ;;  %v86_v3 = vld [vmem:[%s147_s0 + $0x10] sm:$0xf] }
   0x3   :  { %19 = vst [vmem:[#allocation0 + $0x28] sm:$0xf] %v85_v2  ;;  %v87_v4 = vld [vmem:[%s147_s0 + $0xc] sm:$0xf]  ;;  %v88_v5 = vld [vmem:[%s147_s0 + $0x8] sm:$0xf] }
   0x4   :  { %24 = vst [vmem:[#allocation0 + $0x20] sm:$0xf] %v86_v3  ;;  %29 = vst [vmem:[#allocation0 + $0x18] sm:$0xf] %v87_v4  ;;  %v89_v6 = vld [vmem:[%s147_s0 + $0x4] sm:$0xf] }
   0x5   :  { %34 = vst [vmem:[#allocation0 + $0x10] sm:$0xf] %v88_v5  ;;  %v39_v7 = vld [vmem:[%s147_s0] sm:$0xf]  ;;  %38 = vst [vmem:[#allocation0 + $0x8] sm:$0xf] %v89_v6 }
   0x6   :  { %40 = vst [vmem:[#allocation0] sm:$0xf] %v39_v7  ;;  %s93_s0 = smov 24   ;;  %vm75_vm4 = vcmask 130112  }
   0xb   :  { %v50_v8 = vld [vmem:[#allocation0 + $0x3] ss:$8 sm:$0xf0]   ;;  %v60_v9 = vld [vmem:[#allocation0 + $0x2] ss:$8 sm:$0xf0]  }
   0xc   :  { %v70_v14 = vld [vmem:[#allocation0 + $0x1] ss:$8 sm:$0xf0]   ;;  %v42_v17 = vld [vmem:[#allocation0] ss:$8 sm:$0xf0]  }
   0xd   :  { %v48_v10 = vld [vmem:[#allocation0 + $0x3] ss:$8 sm:$0xf]   ;;  %v58_v11 = vld [vmem:[#allocation0 + $0x2] ss:$8 sm:$0xf]  }
   0xe   :  { %v52_v12 = vsel %vm43_vm0, %v50_v8, %v48_v10  ;;  %v68_v13 = vld [vmem:[#allocation0 + $0x1] ss:$8 sm:$0xf]   ;;  %v41_v16 = vld [vmem:[#allocation0] ss:$8 sm:$0xf]   ;;  %v62_v18 = vsel %vm43_vm0, %v60_v9, %v58_v11 }
   0xf   :  { %53 = vrot.lane.b32.xlu0 %v52_v12, %s93_s0  ;;  %v72_v15 = vsel %vm43_vm0, %v70_v14, %v68_v13  ;;  %v44_v19 = vsel %vm43_vm0, %v42_v17, %v41_v16 }
  0x10   :  { %73 = vrot.lane.b32.xlu1 %v72_v15, %s94_s22  ;;  %46 = vst.msk [vmem:[%s148_s1] sm:$0xff] %vm45_vm1, %v44_v19  }
  0x13   :  { %63 = vrot.lane.b32.xlu0 %v62_v18, %s95_s25 }
  0x81   :  { %v54_v20 = vpop.permute.xlu0 %53  }
  0x82   :  { %56 = vst.msk [vmem:[%s148_s1] sm:$0xff] %vm55_vm2, %v54_v20   ;;  %v74_v21 = vpop.permute.xlu1 %73  }
  0x85   :  { %v64_v22 = vpop.permute.xlu0 %63  }
  0x86   :  { %66 = vst.msk [vmem:[%s148_s1] sm:$0xff] %vm65_vm3, %v64_v22  }
  0x87   :  { %76 = vst.msk [vmem:[%s148_s1] sm:$0xff] %vm75_vm4, %v74_v21  }

// kernel: ntn_conv_forward.1
= control target key start
LH: loop header
LB: loop body
LE: loop exit
PB: predicated region body
PF: predicated region fallthrough
CT: control target
= control target key end

     0   :  { %vm19_vm0 = vcmask 64512   ;;  %vm145_vm1 = vcmask 130048   ;;  %vm605_vm4 = vcmask 1043456   ;;  %vm598_vm5 = vcmask 293888   ;;  %s843_s25 = smov 96   ;;  %s959_s2 = inlined_call_operand.vmem [shape: f32[40,16], index: 2, kind: input, shape index: {}]   ;;  %s960_s0 = inlined_call_operand.vmem [shape: f32[16,8], index: 0, kind: input, shape index: {}]   ;;  %s961_s1 = inlined_call_operand.vmem [shape: f32[48,16], index: 1, kind: input, shape index: {}]   ;;  %s962_s3 = inlined_call_operand.vmem [shape: f32[64,36], index: 3, kind: input, shape index: {}]   ;;  %s963_s4 = inlined_call_operand.vmem [shape: f32[16,128], index: 4, kind: output, shape index: {}]  }
   0x1   :  { %v49_v0 = vld [vmem:[%s959_s2] sm:$0xff]  ;;  %v18_v2 = vld [vmem:[%s960_s0 + $0x8] sm:$0xff]  ;;  %v52_v35 = vld [vmem:[%s959_s2 + $0x18] sm:$0xff]  ;;  %vm698_vm6 = vcmask 31744  }
   0x2   :  { %v17_v1 = vld [vmem:[%s960_s0] sm:$0xff]  ;;  %776 = vmatprep.subr.mxu0 %v49_v0  ;;  %v21_v4 = vsel %vm19_vm0, %v18_v2, 0.0  ;;  %v55_v34 = vld [vmem:[%s961_s1 + $0x8] sm:$0xff]  ;;  %v51_v36 = vld [vmem:[%s959_s2 + $0x10] sm:$0xff] }
   0x3   :  { %v20_v3 = vsel %vm19_vm0, %v17_v1, 0.0  ;;  %777 = vmatpush3.msra.mxu0 %v49_v0  ;;  %v54_v31 = vld [vmem:[%s961_s1] sm:$0xff]  ;;  %v725_v37 = vld [vmem:[%s959_s2 + $0x8] ss:$0 sm:$0xff]  ;;  %v56_v46 = vld [vmem:[%s961_s1 + $0x10] sm:$0xff] }
   0x4   :  { %v22_v5 = vadd.f32 %v21_v4, %v20_v3  ;;  %785 = vmatprep.mubr.msk.f32.mxu1 %vm145_vm1, %v54_v31  ;;  %788 = vmatprep.subr.mxu0 %v52_v35  ;;  %v57_v49 = vld [vmem:[%s961_s1 + $0x18] sm:$0xff]  ;;  %v58_v50 = vld [vmem:[%s961_s1 + $0x20] sm:$0xff]  ;;  %v59_v51 = vld [vmem:[%s961_s1 + $0x28] sm:$0xff] }
   0x5   :  { %v415_v52 = vld [vmem:[%s962_s3] sm:$0xff]  ;;  %v416_v53 = vld [vmem:[%s962_s3 + $0x8] sm:$0xff]  ;;  %v421_v63 = vld [vmem:[%s962_s3 + $0x30] sm:$0xf] }
   0x6   :  { %v23_v6 = vrot.slane %v22_v5, 4  ;;  %v730_v55 = vld [vmem:[%s959_s2 + $0x20] ss:$0 sm:$0xff]  ;;  %v420_v0 = vld [vmem:[%s962_s3 + $0x28] sm:$0xff]  ;;  %v417_v3 = vld [vmem:[%s962_s3 + $0x10] sm:$0xff] }
   0x8   :  { %v24_v7 = vadd.f32 %v23_v6, %v22_v5 }
   0xa   :  { %v25_v8 = vrot.slane %v24_v7, 2 }
   0xc   :  { %v26_v9 = vadd.f32 %v25_v8, %v24_v7 }
   0xe   :  { %v27_v10 = vrot.slane %v26_v9, 1 }
  0x10   :  { %v28_v11 = vadd.f32 %v27_v10, %v26_v9 }
  0x12   :  { %v30_v12 = vmul.f32 0.0625, %v28_v11 }
  0x14   :  { %v31_v13 = vsub.f32 %v17_v1, %v30_v12  ;;  %v32_v14 = vsub.f32 %v18_v2, %v30_v12  ;;  %v419_v1 = vld [vmem:[%s962_s3 + $0x20] sm:$0xff]  ;;  %v418_v2 = vld [vmem:[%s962_s3 + $0x18] sm:$0xff] }
  0x16   :  { %v33_v15 = vmul.f32 %v31_v13, %v31_v13  ;;  %v34_v16 = vmul.f32 %v32_v14, %v32_v14 }
  0x18   :  { %v35_v17 = vsel %vm19_vm0, %v33_v15, 0.0  ;;  %v36_v18 = vsel %vm19_vm0, %v34_v16, 0.0 }
  0x19   :  { %v37_v19 = vadd.f32 %v36_v18, %v35_v17 }
  0x1b   :  { %v38_v20 = vrot.slane %v37_v19, 4 }
  0x1d   :  { %v39_v21 = vadd.f32 %v38_v20, %v37_v19 }
  0x1f   :  { %v40_v22 = vrot.slane %v39_v21, 2 }
  0x21   :  { %v41_v23 = vadd.f32 %v40_v22, %v39_v21 }
  0x23   :  { %v42_v24 = vrot.slane %v41_v23, 1 }
  0x25   :  { %v43_v25 = vadd.f32 %v42_v24, %v41_v23  ;;  %v743_v23 = vld [vmem:[%s962_s3 + $0x39] ss:$0 sm:$0xff] }
  0x27   :  { %v44_v26 = vmul.f32 0.0625, %v43_v25 }
  0x29   :  { %v45_v27 = vadd.f32 1e-05, %v44_v26 }
  0x2b   :  { %829 = vrsqrt.f32 %v45_v27 }
  0x38   :  { %v830_v28 = vpop.eup %829 }
  0x39   :  { %v47_v29 = vmul.f32 %v830_v28, %v31_v13  ;;  %v48_v30 = vmul.f32 %v830_v28, %v32_v14  ;;  %v742_v14 = vld [vmem:[%s962_s3 + $0x38] ss:$0 sm:$0xff] }
  0x3b   :  { %778 = vmatprep.mubr.msk.f32.mxu0 %vm19_vm0, %v47_v29 }
  0x3c   :  { %779 = vmatmul.mubr.msk.f32.vlgmr.msra.gmra.mxu0 %vm19_vm0, %v48_v30 }
  0x3d   :  { %789 = vmatpush3.msra.mxu0 %v52_v35 }
  0x3e   :  { %790 = vmatprep.subr.mxu0 %v51_v36 }
  0x3f   :  { %791 = vmatpush3.msra.mxu0 %v51_v36 }
  0x40   :  { %805 = vmatprep.subr.mxu0 %v415_v52 }
  0xfc   :  { %v780_v32 = vpop.f32.mrf.mxu0 }
  0xfd   :  { %781 = vmatprep.subr.mxu1 %v780_v32 }
  0xfe   :  { %v132_v33 = vpop.f32.mrf.mxu0  ;;  %782 = vmatpush3.msra.mxu1 %v780_v32 }
  0xff   :  { %783 = vmatprep.subr.mxu1 %v132_v33 }
 0x100   :  { %784 = vmatpush3.msra.mxu1 %v132_v33 }
 0x101   :  { %786 = vmatmul.mubr.msk.f32.vlgmr.msra.gmra.mxu1 %vm145_vm1, %v55_v34 }
 0x102   :  { %799 = vmatprep.mubr.msk.f32.mxu1 %vm145_vm1, %v56_v46 }
 0x1c1   :  { %v787_v38 = vpop.f32.mrf.mxu1 }
 0x1c2   :  { %v224_v39 = vadd.f32 %v787_v38, %v725_v37 }
 0x1c3   :  { %v218_v40 = vpop.f32.mrf.mxu1 }
 0x1c4   :  { %v219_v41 = vadd.f32 %v725_v37, %v218_v40  ;;  %v230_v42 = vmul.f32 0.1, %v224_v39  ;;  %vm228_vm2 = vcmp.gt.f32.partialorder %v224_v39, 0.0 }
 0x1c6   :  { %vm227_vm3 = vcmp.gt.f32.partialorder %v219_v41, 0.0  ;;  %v229_v43 = vmul.f32 0.1, %v219_v41  ;;  %v232_v45 = vsel %vm228_vm2, %v224_v39, %v230_v42 }
 0x1c8   :  { %v231_v44 = vsel %vm227_vm3, %v219_v41, %v229_v43 }
 0x1c9   :  { %792 = vmatprep.mubr.msk.f32.mxu0 %vm145_vm1, %v231_v44 }
 0x1ca   :  { %793 = vmatmul.mubr.msk.f32.vlgmr.msra.gmra.mxu0 %vm145_vm1, %v232_v45 }
 0x1cb   :  { %806 = vmatpush3.msra.mxu0 %v415_v52 }
 0x1cc   :  { %810 = vmatprep.subr.mxu0 %v416_v53 }
 0x28a   :  { %v794_v47 = vpop.f32.mrf.mxu0 }
 0x28b   :  { %795 = vmatprep.subr.mxu1 %v794_v47 }
 0x28c   :  { %v305_v48 = vpop.f32.mrf.mxu0  ;;  %796 = vmatpush3.msra.mxu1 %v794_v47 }
 0x28d   :  { %797 = vmatprep.subr.mxu1 %v305_v48 }
 0x28e   :  { %798 = vmatpush3.msra.mxu1 %v305_v48 }
 0x28f   :  { %800 = vmatmul.mubr.msk.f32.vlgmr.msra.gmra.mxu1 %vm145_vm1, %v57_v49  ;;  %815 = vmatprep.subr.msk.mxu1 %vm605_vm4, %v421_v63 }
 0x290   :  { %802 = vmatprep.mubr.msk.f32.mxu1 %vm145_vm1, %v58_v50  ;;  %816 = vmatpush3.msk.msra.mxu1 %vm605_vm4, %v421_v63 }
 0x291   :  { %817 = vmatprep.subr.mxu1 %v420_v0 }
 0x292   :  { %818 = vmatpush3.msra.mxu1 %v420_v0 }
 0x293   :  { %803 = vmatmul.mubr.msk.f32.gmra.mxu1 %vm145_vm1, %v59_v51  ;;  %819 = vmatprep.subr.mxu1 %v419_v1 }
 0x294   :  { %820 = vmatpush3.msra.mxu1 %v419_v1 }
 0x295   :  { %821 = vmatprep.subr.mxu1 %v418_v2 }
 0x296   :  { %822 = vmatpush3.msra.mxu1 %v418_v2 }
 0x297   :  { %823 = vmatprep.subr.mxu1 %v417_v3 }
 0x298   :  { %824 = vmatpush3.msra.mxu1 %v417_v3 }
 0x34f   :  { %v801_v54 = vpop.f32.mrf.mxu1 }
 0x350   :  { %v402_v58 = vadd.f32 %v801_v54, %v730_v55 }
 0x351   :  { %v396_v56 = vpop.f32.mrf.mxu1 }
 0x352   :  { %v397_v57 = vadd.f32 %v730_v55, %v396_v56 }
 0x353   :  { %v804_v59 = vpop.f32.mrf.mxu1 }
 0x354   :  { %807 = vmatprep.mubr.msk.f32.mxu0 %vm19_vm0, %v397_v57  ;;  %v412_v62 = vadd.f32 %v804_v59, %v730_v55 }
 0x355   :  { %v406_v60 = vpop.f32.mrf.mxu1  ;;  %808 = vmatmul.mubr.msk.f32.vlgmr.msra.gmra.mxu0 %vm19_vm0, %v402_v58 }
 0x356   :  { %v407_v61 = vadd.f32 %v730_v55, %v406_v60  ;;  %811 = vmatpush3.msra.mxu0 %v416_v53 }
 0x358   :  { %812 = vmatprep.mubr.msk.f32.mxu0 %vm19_vm0, %v407_v61 }
 0x359   :  { %813 = vmatmul.mubr.msk.f32.vlgmr.msra.gmra.mxu0 %vm19_vm0, %v412_v62 }
 0x415   :  { %v809_v4 = vpop.f32.mrf.mxu0 }
 0x417   :  { %v496_v5 = vpop.f32.mrf.mxu0 }
 0x419   :  { %v814_v6 = vpop.f32.mrf.mxu0 }
 0x41a   :  { %v587_v10 = vmul.f32 %v814_v6, %v809_v4  ;;  %v589_v11 = vadd.f32 %v814_v6, %v809_v4 }
 0x41b   :  { %v577_v7 = vpop.f32.mrf.mxu0 }
 0x41c   :  { %v586_v8 = vmul.f32 %v577_v7, %v496_v5  ;;  %v588_v9 = vadd.f32 %v577_v7, %v496_v5 }
 0x41e   :  { %592 = vrot.lane.b32.xlu0 %v588_v9, %s843_s25  ;;  %825 = vmatprep.mubr.msk.f32.mxu1 %vm598_vm5, %v586_v8 }
 0x41f   :  { %826 = vmatmul.mubr.msk.f32.vlgmr.msra.gmra.mxu1 %vm598_vm5, %v587_v10 }
 0x422   :  { %594 = vrot.lane.b32.xlu0 %v589_v11, %s843_s25 }
 0x490   :  { %v593_v12 = vpop.permute.xlu0 %592 }
 0x494   :  { %v595_v13 = vpop.permute.xlu0 %594 }
 0x4df   :  { %v827_v15 = vpop.f32.mrf.mxu1 }
 0x4e0   :  { %v681_v16 = vadd.f32 %v827_v15, %v595_v13 }
 0x4e1   :  { %v675_v17 = vpop.f32.mrf.mxu1 }
 0x4e2   :  { %v689_v18 = vadd.f32 %v742_v14, %v681_v16  ;;  %v676_v19 = vadd.f32 %v675_v17, %v593_v12 }
 0x4e4   :  { %v688_v20 = vadd.f32 %v742_v14, %v676_v19  ;;  %831 = vtanh.f32 %v689_v18 }
 0x4e6   :  { %833 = vtanh.f32 %v688_v20 }
 0x4f1   :  { %v832_v21 = vpop.eup %831 }
 0x4f2   :  { %v697_v26 = vmul.f32 %v832_v21, %v743_v23 }
 0x4f3   :  { %v834_v22 = vpop.eup %833 }
 0x4f4   :  { %v696_v24 = vmul.f32 %v834_v22, %v743_v23  ;;  %v702_v27 = vsel %vm698_vm6, %v697_v26, 0.0 }
 0x4f6   :  { %v699_v25 = vsel %vm698_vm6, %v696_v24, 0.0 }
 0x4f7   :  { %700 = vadd.xlane.f32.xlu1 %v699_v25 }
 0x4fb   :  { %703 = vadd.xlane.f32.xlu1 %v702_v27 }
 0x580   :  { %v701_v28 = vpop.xlane.xlu1 %700 }
 0x581   :  { %v744_v29 = vmul.f32 -1.442695, %v701_v28 }
 0x583   :  { %835 = vpow2.f32 %v744_v29 }
 0x584   :  { %v704_v30 = vpop.xlane.xlu1 %703 }
 0x585   :  { %v745_v31 = vmul.f32 -1.442695, %v704_v30 }
 0x587   :  { %837 = vpow2.f32 %v745_v31 }
 0x590   :  { %v836_v32 = vpop.eup %835 }
 0x591   :  { %v711_v33 = vadd.f32 1.0, %v836_v32 }
 0x593   :  { %839 = vrcp.f32 %v711_v33 }
 0x594   :  { %v838_v34 = vpop.eup %837 }
 0x595   :  { %v712_v35 = vadd.f32 1.0, %v838_v34 }
 0x597   :  { %841 = vrcp.f32 %v712_v35 }
 0x5a0   :  { %v840_v36 = vpop.eup %839 }
 0x5a1   :  { %717 = vst [vmem:[%s963_s4] sm:$0xff] %v840_v36 }
 0x5a4   :  { %v842_v37 = vpop.eup %841 }
 0x5a5   :  { %718 = vst [vmem:[%s963_s4 + $0x8] sm:$0xff] %v842_v37 }

</bundles_post_ra>
